<compile_context>
chip_gen: v7x
topology: tpu7x:2x2x1
jax: 0.10.0
libtpu: 0.0.40
codegen_flags: <defaults>
</compile_context>

<pallas_src>
import functools

import jax
import jax.numpy as jnp
import numpy as np
from jax.experimental import pallas as pl
from jax.experimental.pallas import tpu as pltpu

INPUT_SIZE = 700
HIDDEN = 128
OUT = 20


def _round_up(x, m):
    return (x + m - 1) // m * m


def _num_tensorcores():
    """Best-effort TensorCore count (v7x has 2/chip); conservative default 1."""
    try:
        info = pltpu.get_tpu_info()
    except Exception:
        return 1
    for name in ("num_cores", "core_count", "num_tensorcores", "tensorcore_count"):
        v = getattr(info, name, None)
        if isinstance(v, int) and v > 0:
            return v
    return 1


# ---------------------------------------------------------------------------
# Matmul + bias kernel: hoisted input projection z = x @ W_ih^T + (b_ih+b_hh).
# Parallel grid over M tiles; K=700 and N=128 stay whole (tiny vs VMEM).
# ---------------------------------------------------------------------------
def _matmul_bias_kernel(x_ref, w_ref, b_ref, o_ref):
    o_ref[...] = (
        jnp.dot(x_ref[...], w_ref[...], preferred_element_type=jnp.float32)
        + b_ref[...]
    ).astype(o_ref.dtype)


def matmul_bias(x, w, b, *, block_m=512):
    """x: (M, K), w: (K, N), b: (N,) -> (M, N) float32."""
    M, K = x.shape
    N = w.shape[1]
    bm = min(block_m, _round_up(M, 8))
    Mp = _round_up(M, bm)
    if Mp != M:
        x = jnp.pad(x, ((0, Mp - M), (0, 0)))
    out = pl.pallas_call(
        _matmul_bias_kernel,
        out_shape=jax.ShapeDtypeStruct((Mp, N), jnp.float32),
        grid_spec=pltpu.PrefetchScalarGridSpec(
            num_scalar_prefetch=0,
            grid=(Mp // bm,),
            in_specs=[
                pl.BlockSpec((bm, K), lambda i: (i, 0)),
                pl.BlockSpec((K, N), lambda i: (0, 0)),
                pl.BlockSpec((1, N), lambda i: (0, 0)),
            ],
            out_specs=pl.BlockSpec((bm, N), lambda i: (i, 0)),
        ),
        compiler_params=pltpu.CompilerParams(
            dimension_semantics=("parallel",)),
    )(x, w, b.reshape(1, N))
    return out[:M]


# ---------------------------------------------------------------------------
# Recurrence + fused FC head.
#   per step:   h_t = tanh(z_t + h_{t-1} @ W_hh^T)   (the only serial part)
#   per block:  y   = reshape(h_hist) @ W_fc^T + b_fc  (one MXU matmul)
# z is batch-major (Bp, Tp, 128); y is emitted directly in (Tp, Bp, 20).
# h is carried in VMEM scratch across the sequential time-block grid axis.
# ---------------------------------------------------------------------------
def _rnn_fc_kernel(tblk, z_ref, whh_ref, wfc_ref, bfc_ref, y_ref,
                   h_carry, h_hist):
    t = pl.program_id(1)

    @pl.when(t == 0)
    def _():
        h_carry[...] = jnp.zeros_like(h_carry)

    whh = whh_ref[...]

    if tblk <= 64:
        # Fully unrolled, static indices: best LLO scheduling for short blocks.
        h = h_carry[...]
        for i in range(tblk):
            h = jnp.tanh(
                z_ref[:, i, :]
                + jnp.dot(h, whh, preferred_element_type=jnp.float32))
            h_hist[i] = h
        h_carry[...] = h
    else:
        # Partial unroll keeps code size / vreg pressure bounded.
        def step(i, h):
            h_new = jnp.tanh(
                z_ref[:, i, :]
                + jnp.dot(h, whh, preferred_element_type=jnp.float32))
            h_hist[i] = h_new
            return h_new

        h_carry[...] = jax.lax.fori_loop(0, tblk, step, h_carry[...], unroll=8)

    # Fused FC head: the 128-wide hidden stream never leaves VMEM.
    hist = h_hist[...]                                   # (tblk, bsh, H)
    bsh = hist.shape[1]
    y = (jnp.dot(hist.reshape(tblk * bsh, HIDDEN), wfc_ref[...],
                 preferred_element_type=jnp.float32)
         + bfc_ref[...])
    y_ref[...] = y.reshape(tblk, bsh, OUT)


def _choose_tblk(T, bsh, *, max_tblk=128, vmem_budget_bytes=20 << 20):
    """Time-block size: no (or minimal) padded serial steps, and the pipeline
    buffers (2x z in + h_hist scratch + 2x y out) stay within a budget that
    fits the 32 MiB scoped-VMEM default on every TPU generation."""
    bytes_per_tb = 4 * (2 * HIDDEN + HIDDEN + 2 * OUT)   # per (t, b) element
    cap = max(8, min(max_tblk, vmem_budget_bytes // (bytes_per_tb * bsh)))
    if T <= cap:
        return T                      # one block covers T exactly -> zero pad
    # tblk < Tp must be a multiple of 8 (BlockSpec sublane rule); minimize pad.
    best_tblk, best_pad = 8, (-T) % 8
    for cand in range(16, cap + 1, 8):
        pad = (-T) % cand
        if pad < best_pad or (pad == best_pad and cand > best_tblk):
            best_tblk, best_pad = cand, pad
    return best_tblk


def rnn_fc(z, w_hh_t, w_fc_t, b_fc, *, num_cores=None):
    """z: (Bp, T, 128) batch-major pre-activations -> y: (T, Bp, 20)."""
    Bp, T, H = z.shape
    if num_cores is None:
        num_cores = _num_tensorcores()

    # Cross-TensorCore batch shard only when it can actually help: >=2 cores
    # and a per-shard batch large enough (>=128 rows) to be throughput-bound.
    if num_cores >= 2 and Bp % 16 == 0 and Bp // 2 >= 128:
        nb, bsh = 2, Bp // 2
    else:
        nb, bsh = 1, Bp

    tblk = _choose_tblk(T, bsh)
    Tp = _round_up(T, tblk)
    if Tp != T:
        # Zero-padded timesteps only extend the recurrence past T; y[:T] is
        # unaffected (forward recurrence) and the padding is minimal.
        z = jnp.pad(z, ((0, 0), (0, Tp - T), (0, 0)))

    y = pl.pallas_call(
        functools.partial(_rnn_fc_kernel, tblk),
        out_shape=jax.ShapeDtypeStruct((Tp, Bp, OUT), jnp.float32),
        grid_spec=pltpu.PrefetchScalarGridSpec(
            num_scalar_prefetch=0,
            grid=(nb, Tp // tblk),
            in_specs=[
                pl.BlockSpec((bsh, tblk, H), lambda b, t: (b, t, 0)),
                pl.BlockSpec((H, H), lambda b, t: (0, 0)),
                pl.BlockSpec((H, OUT), lambda b, t: (0, 0)),
                pl.BlockSpec((1, OUT), lambda b, t: (0, 0)),
            ],
            out_specs=pl.BlockSpec((tblk, bsh, OUT), lambda b, t: (t, b, 0)),
            scratch_shapes=[
                pltpu.VMEM((bsh, H), jnp.float32),         # h carry
                pltpu.VMEM((tblk, bsh, H), jnp.float32),   # per-block history
            ],
        ),
        compiler_params=pltpu.CompilerParams(
            dimension_semantics=("parallel", "arbitrary")),
    )(z, w_hh_t, w_fc_t, b_fc.reshape(1, OUT))
    return y[:T]


def p_ann_rnn_forward(x_input, params):
    """x_input: (B, T, 700) float32 -> (T, B, 20) float32."""
    B, T, _ = x_input.shape

    w_ih_t = params["w_ih"].T                      # (700, 128)
    w_hh_t = params["w_hh"].T                      # (128, 128)
    b_rnn = params["b_ih"] + params["b_hh"]        # (128,)
    w_fc_t = params["w_fc"].T                      # (128, 20)
    b_fc = params["b_fc"]                          # (20,)

    # Hoisted input projection: one big parallel MXU matmul in native layout;
    # the result stays batch-major (no transpose HBM pass).
    z = matmul_bias(x_input.reshape(B * T, INPUT_SIZE), w_ih_t, b_rnn)
    z = z.reshape(B, T, HIDDEN)                    # (B, T, 128)

    # Pad batch to the f32 sublane multiple; padded rows are exact zeros and
    # stay zero through tanh(0 + 0 @ W) = 0, then get sliced off.
    num_cores = _num_tensorcores()
    Bp = _round_up(B, 16) if (num_cores >= 2 and B >= 256) else _round_up(B, 8)
    if Bp != B:
        z = jnp.pad(z, ((0, Bp - B), (0, 0), (0, 0)))

    y = rnn_fc(z, w_hh_t, w_fc_t, b_fc, num_cores=num_cores)  # (T, Bp, 20)
    return y[:, :B, :]


def init_params(key):
    """Deterministic init mirroring PyTorch defaults (uniform +/- 1/sqrt(fan))."""
    ks = jax.random.split(key, 6)
    s_rnn = 1.0 / np.sqrt(HIDDEN)
    s_fc = 1.0 / np.sqrt(HIDDEN)
    return {
        "w_ih": jax.random.uniform(ks[0], (HIDDEN, INPUT_SIZE), jnp.float32, -s_rnn, s_rnn),
        "w_hh": jax.random.uniform(ks[1], (HIDDEN, HIDDEN), jnp.float32, -s_rnn, s_rnn),
        "b_ih": jax.random.uniform(ks[2], (HIDDEN,), jnp.float32, -s_rnn, s_rnn),
        "b_hh": jax.random.uniform(ks[3], (HIDDEN,), jnp.float32, -s_rnn, s_rnn),
        "w_fc": jax.random.uniform(ks[4], (OUT, HIDDEN), jnp.float32, -s_fc, s_fc),
        "b_fc": jax.random.uniform(ks[5], (OUT,), jnp.float32, -s_fc, s_fc),
    }


def reference_forward(x_input, params):
    """Pure-JAX reference (lax.scan) for correctness checking."""
    x = jnp.transpose(x_input, (1, 0, 2))            # (T, B, 700)
    B = x.shape[1]

    def step(h, x_t):
        h_new = jnp.tanh(x_t @ params["w_ih"].T + params["b_ih"]
                         + h @ params["w_hh"].T + params["b_hh"])
        return h_new, h_new

    h0 = jnp.zeros((B, HIDDEN), jnp.float32)
    _, hs = jax.lax.scan(step, h0, x)                # (T, B, 128)
    return hs @ params["w_fc"].T + params["b_fc"]    # (T, B, 20)


if __name__ == "__main__":
    key = jax.random.PRNGKey(0)
    k_x, k_p = jax.random.split(key)

    B, T = 2, 8
    x_input = jax.random.normal(k_x, (B, T, INPUT_SIZE), jnp.float32)
    params = init_params(k_p)

    out = p_ann_rnn_forward(x_input, params)
    out = jax.block_until_ready(out)

    ref = jax.block_until_ready(reference_forward(x_input, params))
    assert out.shape == (T, B, OUT)
    np.testing.assert_allclose(np.asarray(out), np.asarray(ref), rtol=1e-4, atol=1e-4)

    print("KERNEL_OK")
</pallas_src>

<mosaic_0001>
module attributes {stable_mosaic.version = 11 : i64} {
  func.func @_matmul_bias_kernel(%arg0: i32, %arg1: memref<16x700xf32, #tpu.memory_space<vmem>>, %arg2: memref<700x128xf32, #tpu.memory_space<vmem>>, %arg3: memref<1x128xf32, #tpu.memory_space<vmem>>, %arg4: memref<16x128xf32, #tpu.memory_space<vmem>>) attributes {dimension_semantics = [#tpu.dimension_semantics<parallel>], iteration_bounds = array<i64: 1>, scalar_prefetch = 0 : i64, scratch_operands = 0 : i64, tpu.core_type = #tpu.core_type<tc>, window_params = [{transform_indices = @transform_0, window_bounds = array<i64: 16, 700>}, {pipeline_mode = #tpu.pipeline_mode<synchronous>, transform_indices = @transform_1, window_bounds = array<i64: 700, 128>}, {pipeline_mode = #tpu.pipeline_mode<synchronous>, transform_indices = @transform_2, window_bounds = array<i64: 1, 128>}, {transform_indices = @transform_3, window_bounds = array<i64: 16, 128>}]} {
    %c0 = arith.constant 0 : index
    %c0_0 = arith.constant 0 : index
    %0 = vector.load %arg1[%c0, %c0_0] : memref<16x700xf32, #tpu.memory_space<vmem>>, vector<16x700xf32>
    %c0_1 = arith.constant 0 : index
    %c0_2 = arith.constant 0 : index
    %1 = vector.load %arg2[%c0_1, %c0_2] : memref<700x128xf32, #tpu.memory_space<vmem>>, vector<700x128xf32>
    %cst = arith.constant dense<0.000000e+00> : vector<16x128xf32>
    %2 = tpu.matmul %0, %1, %cst {dimension_numbers = #tpu.dot_dimension_numbers<[1], [0], [0], [1], [0, 0, 1, 1], [], []>} : vector<16x700xf32>, vector<700x128xf32>, vector<16x128xf32> -> vector<16x128xf32>
    %c0_3 = arith.constant 0 : index
    %c0_4 = arith.constant 0 : index
    %3 = vector.load %arg3[%c0_3, %c0_4] : memref<1x128xf32, #tpu.memory_space<vmem>>, vector<1x128xf32>
    %4 = vector.broadcast %3 : vector<1x128xf32> to vector<16x128xf32>
    %5 = arith.addf %2, %4 : vector<16x128xf32>
    %c0_5 = arith.constant 0 : index
    %c0_6 = arith.constant 0 : index
    %6 = vector.load %arg4[%c0_5, %c0_6] : memref<16x128xf32, #tpu.memory_space<vmem>>, vector<16x128xf32>
    tpu.vector_store %arg4[%c0_5, %c0_6], %5 {strides = array<i32>} : memref<16x128xf32, #tpu.memory_space<vmem>>, vector<16x128xf32>,
    return
  }
  func.func @transform_0(%arg0: i32) -> (i32, i32) {
    %c0_i32 = arith.constant 0 : i32
    %c0_i32_0 = arith.constant 0 : i32
    return %arg0, %c0_i32 : i32, i32
  }
  func.func @transform_1(%arg0: i32) -> (i32, i32) {
    %c0_i32 = arith.constant 0 : i32
    %c0_i32_0 = arith.constant 0 : i32
    %c0_i32_1 = arith.constant 0 : i32
    return %c0_i32, %c0_i32_0 : i32, i32
  }
  func.func @transform_2(%arg0: i32) -> (i32, i32) {
    %c0_i32 = arith.constant 0 : i32
    %c0_i32_0 = arith.constant 0 : i32
    %c0_i32_1 = arith.constant 0 : i32
    return %c0_i32, %c0_i32_0 : i32, i32
  }
  func.func @transform_3(%arg0: i32) -> (i32, i32) {
    %c0_i32 = arith.constant 0 : i32
    %c0_i32_0 = arith.constant 0 : i32
    return %arg0, %c0_i32 : i32, i32
  }
}

</mosaic_0001>

<bundles_post_ra>
// kernel: tpu_custom_call.1
= control target key start
LH: loop header
LB: loop body
LE: loop exit
PB: predicated region body
PF: predicated region fallthrough
CT: control target
= control target key end

     0   :  { %8 = vsyncpa [#allocation3], 0  ;;  %s756_s0 = inlined_call_operand.hbm [shape: f32[16,700], index: 0, kind: input, shape index: {}]   ;;  %s757_s1 = inlined_call_operand.hbm [shape: f32[700,128], index: 1, kind: input, shape index: {}]   ;;  %s758_s2 = inlined_call_operand.vmem [shape: f32[1,128], index: 2, kind: input, shape index: {}]   ;;  %s759_s3 = inlined_call_operand.hbm [shape: f32[16,128], index: 3, kind: output, shape index: {}]  }
   0x1   :  { %9 = vsyncpa [#allocation6], 0 }
   0x2   :  { %10 = vsyncpa [#allocation4], 0  ;;  %s668_s12 = smov [#allocation2]   ;;  %s596_s16 = scalar_lea.hbm %s756_s0, 1536 }
   0x3   :  { %s16_s13 = sshll.u32 %s668_s12, 4  ;;  %p597_p0 = scmp.ne.s32.totalorder %s756_s0, %s596_s16  ;;  %s17_s13 = int_to_ptr.vmem [resolvable:$true] %s16_s13 }
   0x4   :  { %p600_p1 = scmp.lt.u32.totalorder %s596_s16, %s756_s0 }
   0x6   :  { %p602_p2 = pnand %p600_p1, %p597_p0 }
   0x8   :  { %605 = shalt.err (!%p602_p2)
}
   0x9   :  { %s606_s21 = scalar_lea.vmem %s17_s13, 1536  ;;  %p611_p4 = scmp.lt.s32.totalorder %s17_s13, %s17_s13 }
   0xa   :  { %p607_p3 = scmp.ne.s32.totalorder %s17_s13, %s606_s21  ;;  %p612_p5 = scmp.lt.s32.totalorder %s606_s21, %s606_s21 }
   0xc   :  { %p613_p6 = por %p612_p5, %p611_p4 }
   0xe   :  { %p614_p7 = pnand %p613_p6, %p607_p3 }
  0x10   :  { %617 = shalt.err (!%p614_p7)
}
  0x11   :  { %s669_s22 = smov 768   ;;  %s670_s23 = smov 48  }
  0x12   :  { %22 = dma.hbm_to_vmem [thread:$0]  %s756_s0, 1536, %s17_s13, [#allocation3], %s669_s22, %s669_s22, %s670_s23  }
  0x13   :  { %s671_s26 = smov [#allocation5]   ;;  %s618_s30 = scalar_lea.hbm %s757_s1, 11264 }
  0x14   :  { %s28_s27 = sshll.u32 %s671_s26, 4  ;;  %p619_p8 = scmp.ne.s32.totalorder %s757_s1, %s618_s30  ;;  %s29_s27 = int_to_ptr.vmem [resolvable:$true] %s28_s27 }
  0x15   :  { %p622_p9 = scmp.lt.u32.totalorder %s618_s30, %s757_s1 }
  0x17   :  { %p624_p10 = pnand %p622_p9, %p619_p8 }
  0x19   :  { %627 = shalt.err (!%p624_p10)
}
  0x1a   :  { %s628_s8 = scalar_lea.vmem %s29_s27, 11264  ;;  %p633_p12 = scmp.lt.s32.totalorder %s29_s27, %s29_s27 }
  0x1b   :  { %p629_p11 = scmp.ne.s32.totalorder %s29_s27, %s628_s8  ;;  %p634_p13 = scmp.lt.s32.totalorder %s628_s8, %s628_s8 }
  0x1d   :  { %p635_p0 = por %p634_p13, %p633_p12 }
  0x1f   :  { %p636_p1 = pnand %p635_p0, %p629_p11 }
  0x21   :  { %639 = shalt.err (!%p636_p1)
}
  0x22   :  { %s672_s0 = smov 128   ;;  %s673_s9 = smov 8  }
  0x23   :  { %34 = dma.hbm_to_vmem [thread:$0]  %s757_s1, 11264, %s29_s27, [#allocation6], %s672_s0, %s672_s0, %s673_s9  }
  0x24   :  { %662 = dma.done.wait [#allocation3], 1536  }
  0x25   :  { %663 = vsyncadd [#allocation3], 4294965760 }
  0x26   :  { %664 = dma.done.wait [#allocation6], 11264  }
  0x27   :  { %665 = vsyncadd [#allocation6], 4294956032  ;;  %v674_v0 = vmov 0.0|0.0   ;;  %v71_v1 = vld [vmem:[#allocation5 + $0x80] sm:$0xff]  ;;  %v72_v2 = vld [vmem:[#allocation5 + $0x88] sm:$0xff]  ;;  %vm150_vm0 = vcmask 490496  }
  0x28   :  { %550 = vmatprep.subr.bf16.mxu0 %v674_v0  ;;  %v55_v3 = vld [vmem:[#allocation5] sm:$0xff]  ;;  %v486_v4 = vpack.c.bf16 %v72_v2, %v71_v1  ;;  %v56_v5 = vld [vmem:[#allocation5 + $0x8] sm:$0xff]  ;;  %v73_v6 = vld [vmem:[#allocation5 + $0x90] sm:$0xff]  ;;  %vm157_vm1 = vcmask 1043456   ;;  %vm675_vm2 = vmmov 1   ;;  %s676_s13 = smov [#allocation7]  }
  0x29   :  { %v74_v7 = vld [vmem:[#allocation5 + $0x98] sm:$0xff]  ;;  %v488_v8 = vpack.c.bf16 %v56_v5, %v55_v3  ;;  %v57_v10 = vld [vmem:[#allocation5 + $0x10] sm:$0xff]  ;;  %v75_v12 = vld [vmem:[#allocation5 + $0xa0] sm:$0xff]  ;;  %s393_s14 = sshll.u32 %s676_s13, 4  ;;  %s394_s14 = int_to_ptr.vmem [resolvable:$true] %s393_s14 }
  0x2a   :  { %v490_v9 = vpack.c.bf16 %v74_v7, %v73_v6  ;;  %v58_v11 = vld [vmem:[#allocation5 + $0x18] sm:$0xff]  ;;  %487 = vmatprep.subr.bf16.mxu1 %v486_v4  ;;  %v76_v13 = vld [vmem:[#allocation5 + $0xa8] sm:$0xff]  ;;  %v59_v16 = vld [vmem:[#allocation5 + $0x20] sm:$0xff]  ;;  %s640_s15 = scalar_lea.vmem %s394_s14, 256  ;;  %p645_p3 = scmp.lt.s32.totalorder %s394_s14, %s394_s14 }
  0x2b   :  { %489 = vmatpush3.bf16.msra.mxu1 %v488_v8  ;;  %v492_v14 = vpack.c.bf16 %v58_v11, %v57_v10  ;;  %v494_v15 = vpack.c.bf16 %v76_v13, %v75_v12  ;;  %v60_v17 = vld [vmem:[#allocation5 + $0x28] sm:$0xff]  ;;  %v77_v18 = vld [vmem:[#allocation5 + $0xb0] sm:$0xff]  ;;  %v78_v19 = vld [vmem:[#allocation5 + $0xb8] sm:$0xff]  ;;  %p641_p2 = scmp.ne.s32.totalorder %s394_s14, %s640_s15  ;;  %p646_p4 = scmp.lt.s32.totalorder %s640_s15, %s640_s15 }
  0x2c   :  { %491 = vmatprep.subr.bf16.mxu1 %v490_v9  ;;  %v496_v20 = vpack.c.bf16 %v60_v17, %v59_v16  ;;  %v119_v21 = vld [vmem:[#allocation5 + $0x200] sm:$0xff]  ;;  %v120_v22 = vld [vmem:[#allocation5 + $0x208] sm:$0xff]  ;;  %v498_v23 = vpack.c.bf16 %v78_v19, %v77_v18  ;;  %v61_v24 = vld [vmem:[#allocation5 + $0x30] sm:$0xff] }
  0x2d   :  { %v62_v25 = vld [vmem:[#allocation5 + $0x38] sm:$0xff]  ;;  %v79_v26 = vld [vmem:[#allocation5 + $0xc0] sm:$0xff]  ;;  %v551_v27 = vpack.c.bf16 %v120_v22, %v119_v21  ;;  %v80_v28 = vld [vmem:[#allocation5 + $0xc8] sm:$0xff]  ;;  %p647_p5 = por %p646_p4, %p645_p3 }
  0x2e   :  { %v121_v29 = vld [vmem:[#allocation5 + $0x210] sm:$0xff]  ;;  %v122_v30 = vld [vmem:[#allocation5 + $0x218] sm:$0xff]  ;;  %v500_v32 = vpack.c.bf16 %v62_v25, %v61_v24  ;;  %v123_v33 = vld [vmem:[#allocation5 + $0x220] sm:$0xff]  ;;  %v502_v36 = vpack.c.bf16 %v80_v28, %v79_v26 }
  0x2f   :  { %493 = vmatpush3.bf16.msra.mxu1 %v492_v14  ;;  %552 = vmatpush1.bf16.msra.mxu0 %v551_v27  ;;  %v554_v31 = vpack.c.bf16 %v122_v30, %v121_v29  ;;  %v124_v34 = vld [vmem:[#allocation5 + $0x228] sm:$0xff]  ;;  %v63_v37 = vld [vmem:[#allocation5 + $0x40] sm:$0xff]  ;;  %v81_v39 = vld [vmem:[#allocation5 + $0xd0] sm:$0xff]  ;;  %p648_p6 = pnand %p647_p5, %p641_p2 }
  0x30   :  { %495 = vmatprep.subr.bf16.mxu1 %v494_v15  ;;  %553 = vmatprep.subr.bf16.mxu0 %v674_v0  ;;  %v44_v35 = vld [vmem:[#allocation2 + $0x8] sm:$0xff]  ;;  %v82_v40 = vld [vmem:[#allocation5 + $0xd8] sm:$0xff]  ;;  %v557_v41 = vpack.c.bf16 %v124_v34, %v123_v33  ;;  %v125_v43 = vld [vmem:[#allocation5 + $0x230] sm:$0xff] }
  0x31   :  { %v64_v38 = vld [vmem:[#allocation5 + $0x48] sm:$0xff]  ;;  %225 = vmatprep.mubr.f32.mxu1 %v44_v35  ;;  %v126_v44 = vld [vmem:[#allocation5 + $0x238] sm:$0xff]  ;;  %v506_v45 = vpack.c.bf16 %v82_v40, %v81_v39  ;;  %v65_v46 = vld [vmem:[#allocation5 + $0x50] sm:$0xff] }
  0x32   :  { %v504_v42 = vpack.c.bf16 %v64_v38, %v63_v37  ;;  %v66_v47 = vld [vmem:[#allocation5 + $0x58] sm:$0xff]  ;;  %v83_v48 = vld [vmem:[#allocation5 + $0xe0] sm:$0xff]  ;;  %v84_v49 = vld [vmem:[#allocation5 + $0xe8] sm:$0xff]  ;;  %v560_v50 = vpack.c.bf16 %v126_v44, %v125_v43 }
  0x33   :  { %497 = vmatpush3.bf16.msra.mxu1 %v496_v20  ;;  %555 = vmatpush1.bf16.msra.mxu0 %v554_v31  ;;  %v508_v51 = vpack.c.bf16 %v66_v47, %v65_v46  ;;  %v127_v52 = vld [vmem:[#allocation5 + $0x240] sm:$0xff]  ;;  %v128_v53 = vld [vmem:[#allocation5 + $0x248] sm:$0xff]  ;;  %v510_v54 = vpack.c.bf16 %v84_v49, %v83_v48  ;;  %v85_v57 = vld [vmem:[#allocation5 + $0xf0] sm:$0xff] }
  0x34   :  { %499 = vmatprep.subr.bf16.mxu1 %v498_v23  ;;  %556 = vmatprep.subr.bf16.mxu0 %v674_v0  ;;  %v67_v55 = vld [vmem:[#allocation5 + $0x60] sm:$0xff]  ;;  %v68_v56 = vld [vmem:[#allocation5 + $0x68] sm:$0xff]  ;;  %v86_v58 = vld [vmem:[#allocation5 + $0xf8] sm:$0xff]  ;;  %v563_v59 = vpack.c.bf16 %v128_v53, %v127_v52 }
  0x35   :  { %v512_v60 = vpack.c.bf16 %v68_v56, %v67_v55  ;;  %v129_v61 = vld [vmem:[#allocation5 + $0x250] sm:$0xff]  ;;  %v130_v62 = vld [vmem:[#allocation5 + $0x258] sm:$0xff]  ;;  %v514_v63 = vpack.c.bf16 %v86_v58, %v85_v57  ;;  %v103_v3 = vld [vmem:[#allocation5 + $0x180] sm:$0xff] }
  0x36   :  { %v69_v1 = vld [vmem:[#allocation5 + $0x70] sm:$0xff]  ;;  %v70_v2 = vld [vmem:[#allocation5 + $0x78] sm:$0xff]  ;;  %v104_v4 = vld [vmem:[#allocation5 + $0x188] sm:$0xff]  ;;  %v566_v5 = vpack.c.bf16 %v130_v62, %v129_v61 }
  0x37   :  { %501 = vmatpush3.bf16.msra.mxu1 %v500_v32  ;;  %558 = vmatpush1.bf16.msra.mxu0 %v557_v41  ;;  %v516_v6 = vpack.c.bf16 %v70_v2, %v69_v1  ;;  %v131_v7 = vld [vmem:[#allocation5 + $0x260] sm:$0xff]  ;;  %v132_v8 = vld [vmem:[#allocation5 + $0x268] sm:$0xff]  ;;  %v518_v9 = vpack.c.bf16 %v104_v4, %v103_v3  ;;  %v105_v12 = vld [vmem:[#allocation5 + $0x190] sm:$0xff] }
  0x38   :  { %503 = vmatprep.subr.bf16.mxu1 %v502_v36  ;;  %559 = vmatprep.subr.bf16.mxu0 %v674_v0  ;;  %v87_v10 = vld [vmem:[#allocation5 + $0x100] sm:$0xff]  ;;  %v88_v11 = vld [vmem:[#allocation5 + $0x108] sm:$0xff]  ;;  %v106_v13 = vld [vmem:[#allocation5 + $0x198] sm:$0xff]  ;;  %v569_v14 = vpack.c.bf16 %v132_v8, %v131_v7 }
  0x39   :  { %v48_v15 = vld [vmem:[#allocation2 + $0x28] sm:$0xff]  ;;  %v43_v16 = vld [vmem:[#allocation2] sm:$0xff]  ;;  %v520_v17 = vpack.c.bf16 %v88_v11, %v87_v10  ;;  %v133_v18 = vld [vmem:[#allocation5 + $0x270] sm:$0xff]  ;;  %v522_v20 = vpack.c.bf16 %v106_v13, %v105_v12 }
  0x3a   :  { %v134_v19 = vld [vmem:[#allocation5 + $0x278] sm:$0xff]  ;;  %v89_v21 = vld [vmem:[#allocation5 + $0x110] sm:$0xff]  ;;  %408 = vmatprep.mubr.msk.f32.mxu0 %vm150_vm0, %v48_v15  ;;  %v107_v23 = vld [vmem:[#allocation5 + $0x1a0] sm:$0xff] }
  0x3b   :  { %505 = vmatpush3.bf16.msra.mxu1 %v504_v42  ;;  %561 = vmatpush1.bf16.msra.mxu0 %v560_v50  ;;  %v90_v22 = vld [vmem:[#allocation5 + $0x118] sm:$0xff]  ;;  %v108_v24 = vld [vmem:[#allocation5 + $0x1a8] sm:$0xff]  ;;  %v572_v26 = vpack.c.bf16 %v134_v19, %v133_v18  ;;  %v135_v28 = vld [vmem:[#allocation5 + $0x280] sm:$0xff] }
  0x3c   :  { %507 = vmatprep.subr.bf16.mxu1 %v506_v45  ;;  %562 = vmatprep.subr.bf16.mxu0 %v674_v0  ;;  %v50_v25 = vld [vmem:[#allocation2 + $0x38] sm:$0xff]  ;;  %v524_v27 = vpack.c.bf16 %v90_v22, %v89_v21  ;;  %v136_v29 = vld [vmem:[#allocation5 + $0x288] sm:$0xff]  ;;  %v49_v30 = vld [vmem:[#allocation2 + $0x30] sm:$0xff]  ;;  %v526_v31 = vpack.c.bf16 %v108_v24, %v107_v23 }
  0x3d   :  { %v91_v32 = vld [vmem:[#allocation5 + $0x120] sm:$0xff]  ;;  %v92_v33 = vld [vmem:[#allocation5 + $0x128] sm:$0xff]  ;;  %v109_v34 = vld [vmem:[#allocation5 + $0x1b0] sm:$0xff]  ;;  %v575_v37 = vpack.c.bf16 %v136_v29, %v135_v28 }
  0x3e   :  { %v110_v35 = vld [vmem:[#allocation5 + $0x1b8] sm:$0xff]  ;;  %v528_v38 = vpack.c.bf16 %v92_v33, %v91_v32  ;;  %v137_v39 = vld [vmem:[#allocation5 + $0x290] sm:$0xff]  ;;  %v111_v44 = vld [vmem:[#allocation5 + $0x1c0] sm:$0xff] }
  0x3f   :  { %509 = vmatpush3.bf16.msra.mxu1 %v508_v51  ;;  %564 = vmatpush1.bf16.msra.mxu0 %v563_v59  ;;  %v46_v36 = vld [vmem:[#allocation2 + $0x18] sm:$0xff]  ;;  %v530_v41 = vpack.c.bf16 %v110_v35, %v109_v34  ;;  %v93_v42 = vld [vmem:[#allocation5 + $0x130] sm:$0xff]  ;;  %v112_v45 = vld [vmem:[#allocation5 + $0x1c8] sm:$0xff] }
  0x40   :  { %511 = vmatprep.subr.bf16.mxu1 %v510_v54  ;;  %565 = vmatprep.subr.bf16.mxu0 %v674_v0  ;;  %v138_v40 = vld [vmem:[#allocation5 + $0x298] sm:$0xff]  ;;  %v139_v48 = vld [vmem:[#allocation5 + $0x2a0] sm:$0xff]  ;;  %v140_v49 = vld [vmem:[#allocation5 + $0x2a8] sm:$0xff]  ;;  %v534_v50 = vpack.c.bf16 %v112_v45, %v111_v44 }
  0x41   :  { %v94_v43 = vld [vmem:[#allocation5 + $0x138] sm:$0xff]  ;;  %v578_v46 = vpack.c.bf16 %v138_v40, %v137_v39  ;;  %v95_v51 = vld [vmem:[#allocation5 + $0x140] sm:$0xff]  ;;  %v96_v52 = vld [vmem:[#allocation5 + $0x148] sm:$0xff]  ;;  %v581_v55 = vpack.c.bf16 %v140_v49, %v139_v48 }
  0x42   :  { %v532_v47 = vpack.c.bf16 %v94_v43, %v93_v42  ;;  %v113_v53 = vld [vmem:[#allocation5 + $0x1d0] sm:$0xff]  ;;  %v114_v54 = vld [vmem:[#allocation5 + $0x1d8] sm:$0xff]  ;;  %v536_v56 = vpack.c.bf16 %v96_v52, %v95_v51  ;;  %v115_v62 = vld [vmem:[#allocation5 + $0x1e0] sm:$0xff] }
  0x43   :  { %513 = vmatpush3.bf16.msra.mxu1 %v512_v60  ;;  %567 = vmatpush1.bf16.msra.mxu0 %v566_v5  ;;  %v141_v57 = vld [vmem:[#allocation5 + $0x2b0] sm:$0xff]  ;;  %v142_v58 = vld [vmem:[#allocation5 + $0x2b8] sm:$0xf]  ;;  %v538_v59 = vpack.c.bf16 %v114_v54, %v113_v53  ;;  %vm585_vm3 = vmpackc.low %vm157_vm1, %vm675_vm2 }
  0x44   :  { %515 = vmatprep.subr.bf16.mxu1 %v514_v63  ;;  %568 = vmatprep.subr.bf16.mxu0 %v674_v0  ;;  %v97_v60 = vld [vmem:[#allocation5 + $0x150] sm:$0xff]  ;;  %v98_v61 = vld [vmem:[#allocation5 + $0x158] sm:$0xff]  ;;  %v116_v63 = vld [vmem:[#allocation5 + $0x1e8] sm:$0xff]  ;;  %v584_v1 = vpack.c.bf16 %v142_v58, %v141_v57 }
  0x45   :  { %v540_v2 = vpack.c.bf16 %v98_v61, %v97_v60  ;;  %v542_v3 = vpack.c.bf16 %v116_v63, %v115_v62  ;;  %v99_v4 = vld [vmem:[#allocation5 + $0x160] sm:$0xff]  ;;  %v100_v5 = vld [vmem:[#allocation5 + $0x168] sm:$0xff]  ;;  %v118_v7 = vld [vmem:[#allocation5 + $0x1f8] sm:$0xff] }
  0x46   :  { %v47_v8 = vld [vmem:[#allocation2 + $0x20] sm:$0xff]  ;;  %v54_v10 = vld [vmem:[#allocation2 + $0x58] sm:$0xff]  ;;  %v101_v12 = vld [vmem:[#allocation5 + $0x170] sm:$0xff] }
  0x47   :  { %517 = vmatpush3.bf16.msra.mxu1 %v516_v6  ;;  %570 = vmatpush1.bf16.msra.mxu0 %v569_v14  ;;  %v117_v6 = vld [vmem:[#allocation5 + $0x1f0] sm:$0xff]  ;;  %v102_v13 = vld [vmem:[#allocation5 + $0x178] sm:$0xff]  ;;  %v406_v28 = vld [vmem:[%s758_s2] ss:$0 sm:$0xff] }
  0x48   :  { %519 = vmatprep.subr.bf16.mxu1 %v518_v9  ;;  %571 = vmatprep.subr.bf16.mxu0 %v674_v0  ;;  %v544_v9 = vpack.c.bf16 %v100_v5, %v99_v4  ;;  %v546_v11 = vpack.c.bf16 %v118_v7, %v117_v6  ;;  %v548_v14 = vpack.c.bf16 %v102_v13, %v101_v12  ;;  %v45_v15 = vld [vmem:[#allocation2 + $0x10] sm:$0xff] }
  0x4a   :  { %226 = vmatmul.mubr.f32.vlgmr.msra.gmra.mrb[0].mxu1 %v43_v16  ;;  %v52_v16 = vld [vmem:[#allocation2 + $0x48] sm:$0xff] }
  0x4b   :  { %521 = vmatpush3.bf16.msra.mxu1 %v520_v17  ;;  %230 = vmatprep.mubr.f32.mxu1 %v50_v25  ;;  %v51_v17 = vld [vmem:[#allocation2 + $0x40] sm:$0xff] }
  0x4c   :  { %523 = vmatprep.subr.bf16.mxu1 %v522_v20  ;;  %573 = vmatpush1.bf16.msra.mxu0 %v572_v26 }
  0x4d   :  { %574 = vmatprep.subr.bf16.mxu0 %v674_v0 }
  0x4e   :  { %231 = vmatmul.mubr.f32.gmra.mrb[2].mxu1 %v49_v30 }
  0x4f   :  { %525 = vmatpush3.bf16.msra.mxu1 %v524_v27  ;;  %300 = vmatprep.mubr.f32.mxu1 %v46_v36 }
  0x50   :  { %527 = vmatprep.subr.bf16.mxu1 %v526_v31  ;;  %576 = vmatpush1.bf16.msra.mxu0 %v575_v37 }
  0x51   :  { %577 = vmatprep.subr.bf16.mxu0 %v674_v0 }
  0x53   :  { %529 = vmatpush3.bf16.msra.mxu1 %v528_v38 }
  0x54   :  { %531 = vmatprep.subr.bf16.mxu1 %v530_v41  ;;  %579 = vmatpush1.bf16.msra.mxu0 %v578_v46 }
  0x55   :  { %580 = vmatprep.subr.bf16.mxu0 %v674_v0 }
  0x57   :  { %533 = vmatpush3.bf16.msra.mxu1 %v532_v47 }
  0x58   :  { %535 = vmatprep.subr.bf16.mxu1 %v534_v50  ;;  %582 = vmatpush1.bf16.msra.mxu0 %v581_v55 }
  0x59   :  { %583 = vmatprep.subr.bf16.mxu0 %v674_v0  ;;  %v53_v0 = vld [vmem:[#allocation2 + $0x50] sm:$0xff] }
  0x5b   :  { %537 = vmatpush3.bf16.msra.mxu1 %v536_v56 }
  0x5c   :  { %539 = vmatprep.subr.bf16.mxu1 %v538_v59  ;;  %586 = vmatpush1.bf16.msk.msra.mxu0 %vm585_vm3, %v584_v1 }
  0x5f   :  { %541 = vmatpush3.bf16.msra.mxu1 %v540_v2  ;;  %376 = vmatmul.mubr.f32.vlgmr.msra.gmra.mrb[0].mxu0 %v47_v8 }
  0x60   :  { %543 = vmatprep.subr.bf16.mxu1 %v542_v3  ;;  %409 = vmatprep.mubr.msk.f32.mxu0 %vm150_vm0, %v54_v10 }
  0x63   :  { %545 = vmatpush3.bf16.msra.mxu1 %v544_v9  ;;  %381 = vmatmul.mubr.f32.gmra.mrb[2].mxu0 %v53_v0 }
  0x64   :  { %547 = vmatprep.subr.bf16.mxu1 %v546_v11 }
  0x67   :  { %549 = vmatpush3.bf16.msra.mxu1 %v548_v14 }
  0x6a   :  { %301 = vmatmul.mubr.f32.vlgmr.msra.gmra.mrb[4].mxu1 %v45_v15 }
  0x6b   :  { %305 = vmatprep.mubr.f32.mxu1 %v52_v16 }
  0x6e   :  { %306 = vmatmul.mubr.f32.gmra.mrb[6].mxu1 %v51_v17 }
 0x11d   :  { %v442_v18 = vpop.f32.mrb[0].mxu1 }
 0x11e   :  { %v443_v19 = vpop.f32.mrb[1].mxu1 }
 0x11f   :  { %v444_v20 = vadd.f32 %v443_v19, %v442_v18 }
 0x121   :  { %v445_v21 = vpop.f32.mrb[2].mxu1  ;;  %v228_v31 = vadd.f32 %v444_v20, %v406_v28 }
 0x122   :  { %v446_v22 = vpop.f32.mrb[3].mxu1 }
 0x123   :  { %v447_v23 = vadd.f32 %v446_v22, %v445_v21 }
 0x125   :  { %v233_v36 = vadd.f32 %v447_v23, %v406_v28 }
 0x132   :  { %v377_v24 = vpop.f32.mrb[0].mxu0 }
 0x133   :  { %v379_v25 = vpop.f32.mrb[1].mxu0 }
 0x136   :  { %v382_v26 = vpop.f32.mrb[2].mxu0 }
 0x137   :  { %v384_v27 = vpop.f32.mrb[3].mxu0 }
 0x13d   :  { %v480_v29 = vpop.f32.mrb[4].mxu1 }
 0x13e   :  { %v481_v30 = vpop.f32.mrb[5].mxu1 }
 0x13f   :  { %v482_v32 = vadd.f32 %v481_v30, %v480_v29 }
 0x141   :  { %v483_v33 = vpop.f32.mrb[6].mxu1  ;;  %v303_v34 = vadd.f32 %v482_v32, %v228_v31 }
 0x142   :  { %v484_v35 = vpop.f32.mrb[7].mxu1 }
 0x143   :  { %v378_v37 = vadd.f32 %v377_v24, %v303_v34  ;;  %v485_v38 = vadd.f32 %v484_v35, %v483_v33 }
 0x145   :  { %386 = vst [vmem:[#allocation7] sm:$0xff] %v378_v37  ;;  %v308_v39 = vadd.f32 %v485_v38, %v233_v36 }
 0x147   :  { %v383_v40 = vadd.f32 %v382_v26, %v308_v39 }
 0x149   :  { %387 = vst [vmem:[#allocation7 + $0x8] sm:$0xff] %v383_v40 }
 0x14a   :  { %651 = shalt.err (!%p648_p6)
}
 0x14b   :  { %s652_s17 = scalar_lea.hbm %s759_s3, 256 }
 0x14c   :  { %p653_p7 = scmp.ne.s32.totalorder %s759_s3, %s652_s17  ;;  %p656_p8 = scmp.lt.u32.totalorder %s652_s17, %s759_s3 }
 0x14e   :  { %p658_p9 = pnand %p656_p8, %p653_p7 }
 0x150   :  { %661 = shalt.err (!%p658_p9)
}
 0x151   :  { %399 = dma.vmem_to_hbm [thread:$0]  %s394_s14, 256, %s759_s3, [#allocation4], %s672_s0, %s672_s0, %s673_s9  }
 0x152   :  { %666 = dma.done.wait [#allocation4], 256  }
 0x153   :  { %667 = vsyncadd [#allocation4], 4294967040 }
 0x154   :  { %403 = vsyncpa [#allocation3], 1 }
 0x155   :  { %404 = vsyncpa [#allocation6], 1 }
 0x156   :  { %405 = vsyncpa [#allocation4], 1 }

</bundles_post_ra>
